<compile_context>
chip_gen: v5e
topology: v5e:2x2
jax: 0.10.0
libtpu: 0.0.40
codegen_flags: <defaults>
</compile_context>

<pallas_src>
import jax
import jax.numpy as jnp
from jax.experimental import pallas as pl
from jax.experimental.pallas import tpu as pltpu

NUM_CLASSES = 7
NUM_NODE_FEATURES = 1
CLASS_PAD = 128  # lane-dense output width


def gnn_kernel(adj_ref, xp_ref, seg_ref, w1_ref, w2_ref, b2_ref, w3_ref, b3_ref,
               wl_ref, bl_ref, out_ref):
    H = b2_ref.shape[-1]
    bf16 = jnp.bfloat16

    adj = adj_ref[0]                          # [Bn, Bn] bf16 block-diagonal 0/1 (exact)
    xp = xp_ref[0]                            # [Bn, 2]  f32: [node feature | mean-pool weight]
    x = xp[:, 0:1]                            # [Bn, 1]
    pw = xp[:, 1:2]                           # [Bn, 1]

    # ---- layer 1 (in_features == 1): root/rel terms are VPU outer products; only the
    # neighbor aggregation touches the MXU (bf16 operands, lane-dense N = H output). ----
    w1_root = w1_ref[0:1, :]                  # [1, H] f32
    w1_rel = w1_ref[1:2, :]                   # [1, H]
    b1 = w1_ref[2:3, :]                       # [1, H]
    x_rel = x * w1_rel                        # [Bn, H]  (rank-1: A@(x*w) == (A@x)*w)
    agg1 = jnp.dot(adj, x_rel.astype(bf16), preferred_element_type=jnp.float32)
    h = jnp.maximum(x * w1_root + agg1 + b1, 0.0)

    # ---- layers 2/3: one block-diag aggregation + two accumulated weight dots
    # (replaces the previous concat([h, agg]) -> no lane-relayout copy). ----
    def graph_conv(h, w_ref, b_ref):
        h_bf = h.astype(bf16)
        agg = jnp.dot(adj, h_bf, preferred_element_type=jnp.float32)             # [Bn, H]
        out = jnp.dot(h_bf, w_ref[:H, :], preferred_element_type=jnp.float32)    # root term
        out = out + jnp.dot(agg.astype(bf16), w_ref[H:, :],
                            preferred_element_type=jnp.float32)                  # rel term
        return out + b_ref[...]

    h = jnp.maximum(graph_conv(h, w2_ref, b2_ref), 0.0)
    h = graph_conv(h, w3_ref, b3_ref)

    # ---- global mean pool: 0/1 segment matrix @ (h * per-node mean weight) ----
    pooled = jnp.dot(seg_ref[...], (h * pw).astype(bf16),
                     preferred_element_type=jnp.float32)                         # [B, H]

    # dropout p=0.5: eval mode -> identity
    logits = jnp.dot(pooled.astype(bf16), wl_ref[...],
                     preferred_element_type=jnp.float32) + bl_ref[...]           # [B, 128]
    out_ref[...] = logits                     # lane-dense, multi-sublane unmasked store


def gnn_forward(adj_g, x_g, pool_g, params, *, graphs_per_block=8):
    """adj_g: [G, n, n] (A[g, dst, src] = 1), x_g: [G, n, 1] f32, pool_g: [G, n, 1] f32."""
    G, n, _ = adj_g.shape
    F = x_g.shape[-1]
    assert F == 1 and NUM_NODE_FEATURES == 1, "layer-1 fast path assumes a single node feature"
    H = params["b1"].shape[-1]

    B = graphs_per_block
    assert B % 8 == 0, "graphs_per_block must be a multiple of 8 (sublane-aligned output tile)"
    Gb = -(-G // B)          # grid steps; keep >= 2 on v7x so both TensorCores get work
    Gp = Gb * B
    Bn = B * n

    # ---- pad the graph axis to whole blocks (padded graphs contribute nothing, sliced off) ----
    pad = ((0, Gp - G), (0, 0), (0, 0))
    adj_p = jnp.pad(adj_g.astype(jnp.float32), pad)
    x_p = jnp.pad(x_g, pad)
    pool_p = jnp.pad(pool_g, pad)

    # ---- block-diagonal adjacency per tile: one [Bn,Bn]@[Bn,H] MXU pass per layer ----
    adj_r = adj_p.reshape(Gb, B, n, n)
    blkadj = jnp.einsum('gbij,bc->gbicj', adj_r, jnp.eye(B, dtype=jnp.float32))
    blkadj = blkadj.reshape(Gb, Bn, Bn).astype(jnp.bfloat16)       # 0/1 entries exact in bf16

    # ---- node features + per-node mean-pool weights merged into a single per-tile input ----
    xp = jnp.concatenate([x_p, pool_p], axis=-1).reshape(Gb, Bn, 1 + F)

    # ---- resident constants (constant index_map -> DMA'd once, VMEM-resident) ----
    seg = jnp.kron(jnp.eye(B, dtype=jnp.float32),
                   jnp.ones((1, n), jnp.float32)).astype(jnp.bfloat16)            # [B, Bn] 0/1
    w1 = jnp.concatenate([params["w1_root"], params["w1_rel"], params["b1"]], axis=0)  # [3, H]
    w2 = jnp.concatenate([params["w2_root"], params["w2_rel"]], axis=0).astype(jnp.bfloat16)
    b2 = params["b2"]
    w3 = jnp.concatenate([params["w3_root"], params["w3_rel"]], axis=0).astype(jnp.bfloat16)
    b3 = params["b3"]
    wl = (jnp.zeros((H, CLASS_PAD), jnp.float32)
          .at[:, :NUM_CLASSES].set(params["w_lin"]).astype(jnp.bfloat16))
    bl = jnp.zeros((1, CLASS_PAD), jnp.float32).at[:, :NUM_CLASSES].set(params["b_lin"])

    flops = Gb * (3 * 2 * Bn * Bn * H        # neighbor aggregations (layers 1-3)
                  + 4 * 2 * Bn * H * H       # root/rel weight matmuls (layers 2-3)
                  + 2 * 2 * Bn * H           # layer-1 outer products
                  + 2 * B * Bn * H           # global mean pool
                  + 2 * B * H * CLASS_PAD)   # classifier
    bytes_accessed = (Gb * (Bn * Bn * 2 + Bn * (1 + F) * 4 + B * CLASS_PAD * 4)
                      + int(w1.size) * 4 + int(w2.size) * 2 + int(b2.size) * 4
                      + int(w3.size) * 2 + int(b3.size) * 4
                      + int(wl.size) * 2 + int(bl.size) * 4 + int(seg.size) * 2)
    cost = pl.CostEstimate(flops=flops, transcendentals=0, bytes_accessed=bytes_accessed)

    out = pl.pallas_call(
        gnn_kernel,
        out_shape=jax.ShapeDtypeStruct((Gp, CLASS_PAD), jnp.float32),
        grid=(Gb,),
        in_specs=[
            pl.BlockSpec((1, Bn, Bn), lambda g: (g, 0, 0)),      # block-diag adjacency (per tile)
            pl.BlockSpec((1, Bn, 1 + F), lambda g: (g, 0, 0)),   # [feature | pool weight] (per tile)
            pl.BlockSpec((B, Bn), lambda g: (0, 0)),             # segment matrix (resident)
            pl.BlockSpec((3, H), lambda g: (0, 0)),              # layer-1 root/rel/bias (resident)
            pl.BlockSpec((2 * H, H), lambda g: (0, 0)),          # layer-2 fused weights (resident)
            pl.BlockSpec((1, H), lambda g: (0, 0)),              # layer-2 bias
            pl.BlockSpec((2 * H, H), lambda g: (0, 0)),          # layer-3 fused weights
            pl.BlockSpec((1, H), lambda g: (0, 0)),              # layer-3 bias
            pl.BlockSpec((H, CLASS_PAD), lambda g: (0, 0)),      # classifier weight (lane-padded)
            pl.BlockSpec((1, CLASS_PAD), lambda g: (0, 0)),      # classifier bias (lane-padded)
        ],
        out_specs=pl.BlockSpec((B, CLASS_PAD), lambda g: (g, 0)),
        compiler_params=pltpu.CompilerParams(dimension_semantics=("parallel",)),
        cost_estimate=cost,
    )(blkadj, xp, seg, w1, w2, b2, w3, b3, wl, bl)

    return out[:G, :NUM_CLASSES]


def make_params(key, hidden):
    ks = jax.random.split(key, 11)

    def lin(k, fan_in, fan_out):
        bound = 1.0 / jnp.sqrt(jnp.float32(fan_in))
        return jax.random.uniform(k, (fan_in, fan_out), jnp.float32, -bound, bound)

    return {
        "w1_root": lin(ks[0], NUM_NODE_FEATURES, hidden),
        "w1_rel":  lin(ks[1], NUM_NODE_FEATURES, hidden),
        "b1":      jax.random.uniform(ks[2], (1, hidden), jnp.float32, -0.1, 0.1),
        "w2_root": lin(ks[3], hidden, hidden),
        "w2_rel":  lin(ks[4], hidden, hidden),
        "b2":      jax.random.uniform(ks[5], (1, hidden), jnp.float32, -0.1, 0.1),
        "w3_root": lin(ks[6], hidden, hidden),
        "w3_rel":  lin(ks[7], hidden, hidden),
        "b3":      jax.random.uniform(ks[8], (1, hidden), jnp.float32, -0.1, 0.1),
        "w_lin":   lin(ks[9], hidden, NUM_CLASSES),
        "b_lin":   jax.random.uniform(ks[10], (1, NUM_CLASSES), jnp.float32, -0.1, 0.1),
    }


def build_graph_inputs(key, num_graphs, nodes_per_graph):
    # Edge list from the reference script (one 16-node graph), replicated per graph.
    base_edges = [(0, 1), (1, 2), (2, 3), (0, 4), (4, 5), (5, 6), (0, 7), (7, 8),
                  (8, 9), (0, 10), (10, 11), (11, 12), (0, 13), (13, 14), (14, 15)]
    src = jnp.array([s for s, _ in base_edges], jnp.int32)
    dst = jnp.array([d for _, d in base_edges], jnp.int32)
    adj_one = jnp.zeros((nodes_per_graph, nodes_per_graph), jnp.float32).at[dst, src].set(1.0)
    adj_g = jnp.broadcast_to(adj_one, (num_graphs, nodes_per_graph, nodes_per_graph))

    x_g = jax.random.normal(key, (num_graphs, nodes_per_graph, NUM_NODE_FEATURES), jnp.float32)
    pool_g = jnp.full((num_graphs, nodes_per_graph, 1), 1.0 / nodes_per_graph, jnp.float32)
    return adj_g, x_g, pool_g


def reference_forward(adj_g, x_g, pool_g, params):
    """Full-f32 pure-JAX reference."""
    def gc(h, wr, wn, b):
        agg = jnp.einsum('gij,gjf->gif', adj_g, h)
        return (jnp.einsum('gnf,fo->gno', h, wr)
                + jnp.einsum('gnf,fo->gno', agg, wn) + b)

    h = jax.nn.relu(gc(x_g, params["w1_root"], params["w1_rel"], params["b1"]))
    h = jax.nn.relu(gc(h, params["w2_root"], params["w2_rel"], params["b2"]))
    h = gc(h, params["w3_root"], params["w3_rel"], params["b3"])
    pooled = jnp.sum(h * pool_g, axis=1)                        # [G, H]
    return pooled @ params["w_lin"] + params["b_lin"]


if __name__ == "__main__":
    hidden = 32
    num_graphs = 16          # with graphs_per_block=8 -> grid of 2 blocks (both v7x TCs busy)
    nodes_per_graph = 16

    key = jax.random.PRNGKey(0)
    k_x, k_p = jax.random.split(key)

    adj_g, x_g, pool_g = build_graph_inputs(k_x, num_graphs, nodes_per_graph)
    params = make_params(k_p, hidden)

    out = gnn_forward(adj_g, x_g, pool_g, params, graphs_per_block=8)
    out = jax.block_until_ready(out)

    ref = reference_forward(adj_g, x_g, pool_g, params)
    assert out.shape == (num_graphs, NUM_CLASSES)
    # Kernel uses bf16 MXU operands with f32 accumulation (per perf review); adjacency is exact
    # in bf16 but activation/weight rounding vs. the f32 reference needs a bf16-level tolerance.
    assert jnp.allclose(out, ref, atol=3e-2, rtol=3e-2), float(jnp.max(jnp.abs(out - ref)))

    print("KERNEL_OK")
</pallas_src>

<mosaic_0001>
module attributes {stable_mosaic.version = 11 : i64} {
  func.func @gnn_kernel(%arg0: i32, %arg1: memref<1x128x128xbf16, #tpu.memory_space<vmem>>, %arg2: memref<1x128x2xf32, #tpu.memory_space<vmem>>, %arg3: memref<8x128xbf16, #tpu.memory_space<vmem>>, %arg4: memref<3x32xf32, #tpu.memory_space<vmem>>, %arg5: memref<64x32xbf16, #tpu.memory_space<vmem>>, %arg6: memref<1x32xf32, #tpu.memory_space<vmem>>, %arg7: memref<64x32xbf16, #tpu.memory_space<vmem>>, %arg8: memref<1x32xf32, #tpu.memory_space<vmem>>, %arg9: memref<32x128xbf16, #tpu.memory_space<vmem>>, %arg10: memref<1x128xf32, #tpu.memory_space<vmem>>, %arg11: memref<8x128xf32, #tpu.memory_space<vmem>>) attributes {dimension_semantics = [#tpu.dimension_semantics<parallel>], iteration_bounds = array<i64: 2>, scalar_prefetch = 0 : i64, scratch_operands = 0 : i64, tpu.core_type = #tpu.core_type<tc>, window_params = [{transform_indices = @transform_0, window_bounds = array<i64: 1, 128, 128>}, {transform_indices = @transform_1, window_bounds = array<i64: 1, 128, 2>}, {pipeline_mode = #tpu.pipeline_mode<synchronous>, transform_indices = @transform_2, window_bounds = array<i64: 8, 128>}, {pipeline_mode = #tpu.pipeline_mode<synchronous>, transform_indices = @transform_3, window_bounds = array<i64: 3, 32>}, {pipeline_mode = #tpu.pipeline_mode<synchronous>, transform_indices = @transform_4, window_bounds = array<i64: 64, 32>}, {pipeline_mode = #tpu.pipeline_mode<synchronous>, transform_indices = @transform_5, window_bounds = array<i64: 1, 32>}, {pipeline_mode = #tpu.pipeline_mode<synchronous>, transform_indices = @transform_6, window_bounds = array<i64: 64, 32>}, {pipeline_mode = #tpu.pipeline_mode<synchronous>, transform_indices = @transform_7, window_bounds = array<i64: 1, 32>}, {pipeline_mode = #tpu.pipeline_mode<synchronous>, transform_indices = @transform_8, window_bounds = array<i64: 32, 128>}, {pipeline_mode = #tpu.pipeline_mode<synchronous>, transform_indices = @transform_9, window_bounds = array<i64: 1, 128>}, {transform_indices = @transform_10, window_bounds = array<i64: 8, 128>}]} {
    %c0 = arith.constant 0 : index
    %c0_0 = arith.constant 0 : index
    %c0_1 = arith.constant 0 : index
    %0 = vector.load %arg1[%c0, %c0_0, %c0_1] : memref<1x128x128xbf16, #tpu.memory_space<vmem>>, vector<1x128x128xbf16>
    %1 = vector.shape_cast %0 : vector<1x128x128xbf16> to vector<128x128xbf16>
    %c0_2 = arith.constant 0 : index
    %c0_3 = arith.constant 0 : index
    %c0_4 = arith.constant 0 : index
    %2 = vector.load %arg2[%c0_2, %c0_3, %c0_4] : memref<1x128x2xf32, #tpu.memory_space<vmem>>, vector<1x128x2xf32>
    %3 = vector.shape_cast %2 : vector<1x128x2xf32> to vector<128x2xf32>
    %4 = vector.extract_strided_slice %3 {offsets = [0, 0], sizes = [128, 1], strides = [1, 1]} : vector<128x2xf32> to vector<128x1xf32>
    %5 = vector.extract_strided_slice %3 {offsets = [0, 1], sizes = [128, 1], strides = [1, 1]} : vector<128x2xf32> to vector<128x1xf32>
    %c0_5 = arith.constant 0 : index
    %c0_6 = arith.constant 0 : index
    %6 = vector.load %arg4[%c0_5, %c0_6] : memref<3x32xf32, #tpu.memory_space<vmem>>, vector<1x32xf32>
    %c1 = arith.constant 1 : index
    %c0_7 = arith.constant 0 : index
    %7 = vector.load %arg4[%c1, %c0_7] : memref<3x32xf32, #tpu.memory_space<vmem>>, vector<1x32xf32>
    %c2 = arith.constant 2 : index
    %c0_8 = arith.constant 0 : index
    %8 = vector.load %arg4[%c2, %c0_8] : memref<3x32xf32, #tpu.memory_space<vmem>>, vector<1x32xf32>
    %9 = vector.broadcast %4 : vector<128x1xf32> to vector<128x32xf32>
    %10 = vector.broadcast %7 : vector<1x32xf32> to vector<128x32xf32>
    %11 = arith.mulf %9, %10 : vector<128x32xf32>
    %12 = arith.truncf %11 : vector<128x32xf32> to vector<128x32xbf16>
    %cst = arith.constant dense<0.000000e+00> : vector<128x32xf32>
    %13 = tpu.matmul %1, %12, %cst {dimension_numbers = #tpu.dot_dimension_numbers<[1], [0], [0], [1], [0, 0, 1, 1], [], []>} : vector<128x128xbf16>, vector<128x32xbf16>, vector<128x32xf32> -> vector<128x32xf32>
    %14 = vector.broadcast %4 : vector<128x1xf32> to vector<128x32xf32>
    %15 = vector.broadcast %6 : vector<1x32xf32> to vector<128x32xf32>
    %16 = arith.mulf %14, %15 : vector<128x32xf32>
    %17 = arith.addf %16, %13 : vector<128x32xf32>
    %18 = vector.broadcast %8 : vector<1x32xf32> to vector<128x32xf32>
    %19 = arith.addf %17, %18 : vector<128x32xf32>
    %cst_9 = arith.constant 0.000000e+00 : f32
    %20 = vector.broadcast %cst_9 : f32 to vector<128x32xf32>
    %21 = arith.maximumf %19, %20 : vector<128x32xf32>
    %22 = arith.truncf %21 : vector<128x32xf32> to vector<128x32xbf16>
    %cst_10 = arith.constant dense<0.000000e+00> : vector<128x32xf32>
    %23 = tpu.matmul %1, %22, %cst_10 {dimension_numbers = #tpu.dot_dimension_numbers<[1], [0], [0], [1], [0, 0, 1, 1], [], []>} : vector<128x128xbf16>, vector<128x32xbf16>, vector<128x32xf32> -> vector<128x32xf32>
    %c0_11 = arith.constant 0 : index
    %c0_12 = arith.constant 0 : index
    %24 = vector.load %arg5[%c0_11, %c0_12] : memref<64x32xbf16, #tpu.memory_space<vmem>>, vector<32x32xbf16>
    %cst_13 = arith.constant dense<0.000000e+00> : vector<128x32xf32>
    %25 = tpu.matmul %22, %24, %cst_13 {dimension_numbers = #tpu.dot_dimension_numbers<[1], [0], [0], [1], [0, 0, 1, 1], [], []>} : vector<128x32xbf16>, vector<32x32xbf16>, vector<128x32xf32> -> vector<128x32xf32>
    %26 = arith.truncf %23 : vector<128x32xf32> to vector<128x32xbf16>
    %c32 = arith.constant 32 : index
    %c0_14 = arith.constant 0 : index
    %27 = vector.load %arg5[%c32, %c0_14] : memref<64x32xbf16, #tpu.memory_space<vmem>>, vector<32x32xbf16>
    %cst_15 = arith.constant dense<0.000000e+00> : vector<128x32xf32>
    %28 = tpu.matmul %26, %27, %cst_15 {dimension_numbers = #tpu.dot_dimension_numbers<[1], [0], [0], [1], [0, 0, 1, 1], [], []>} : vector<128x32xbf16>, vector<32x32xbf16>, vector<128x32xf32> -> vector<128x32xf32>
    %29 = arith.addf %25, %28 : vector<128x32xf32>
    %c0_16 = arith.constant 0 : index
    %c0_17 = arith.constant 0 : index
    %30 = vector.load %arg6[%c0_16, %c0_17] : memref<1x32xf32, #tpu.memory_space<vmem>>, vector<1x32xf32>
    %31 = vector.broadcast %30 : vector<1x32xf32> to vector<128x32xf32>
    %32 = arith.addf %29, %31 : vector<128x32xf32>
    %cst_18 = arith.constant 0.000000e+00 : f32
    %33 = vector.broadcast %cst_18 : f32 to vector<128x32xf32>
    %34 = arith.maximumf %32, %33 : vector<128x32xf32>
    %35 = arith.truncf %34 : vector<128x32xf32> to vector<128x32xbf16>
    %cst_19 = arith.constant dense<0.000000e+00> : vector<128x32xf32>
    %36 = tpu.matmul %1, %35, %cst_19 {dimension_numbers = #tpu.dot_dimension_numbers<[1], [0], [0], [1], [0, 0, 1, 1], [], []>} : vector<128x128xbf16>, vector<128x32xbf16>, vector<128x32xf32> -> vector<128x32xf32>
    %c0_20 = arith.constant 0 : index
    %c0_21 = arith.constant 0 : index
    %37 = vector.load %arg7[%c0_20, %c0_21] : memref<64x32xbf16, #tpu.memory_space<vmem>>, vector<32x32xbf16>
    %cst_22 = arith.constant dense<0.000000e+00> : vector<128x32xf32>
    %38 = tpu.matmul %35, %37, %cst_22 {dimension_numbers = #tpu.dot_dimension_numbers<[1], [0], [0], [1], [0, 0, 1, 1], [], []>} : vector<128x32xbf16>, vector<32x32xbf16>, vector<128x32xf32> -> vector<128x32xf32>
    %39 = arith.truncf %36 : vector<128x32xf32> to vector<128x32xbf16>
    %c32_23 = arith.constant 32 : index
    %c0_24 = arith.constant 0 : index
    %40 = vector.load %arg7[%c32_23, %c0_24] : memref<64x32xbf16, #tpu.memory_space<vmem>>, vector<32x32xbf16>
    %cst_25 = arith.constant dense<0.000000e+00> : vector<128x32xf32>
    %41 = tpu.matmul %39, %40, %cst_25 {dimension_numbers = #tpu.dot_dimension_numbers<[1], [0], [0], [1], [0, 0, 1, 1], [], []>} : vector<128x32xbf16>, vector<32x32xbf16>, vector<128x32xf32> -> vector<128x32xf32>
    %42 = arith.addf %38, %41 : vector<128x32xf32>
    %c0_26 = arith.constant 0 : index
    %c0_27 = arith.constant 0 : index
    %43 = vector.load %arg8[%c0_26, %c0_27] : memref<1x32xf32, #tpu.memory_space<vmem>>, vector<1x32xf32>
    %44 = vector.broadcast %43 : vector<1x32xf32> to vector<128x32xf32>
    %45 = arith.addf %42, %44 : vector<128x32xf32>
    %c0_28 = arith.constant 0 : index
    %c0_29 = arith.constant 0 : index
    %46 = vector.load %arg3[%c0_28, %c0_29] : memref<8x128xbf16, #tpu.memory_space<vmem>>, vector<8x128xbf16>
    %47 = vector.broadcast %5 : vector<128x1xf32> to vector<128x32xf32>
    %48 = arith.mulf %45, %47 : vector<128x32xf32>
    %49 = arith.truncf %48 : vector<128x32xf32> to vector<128x32xbf16>
    %cst_30 = arith.constant dense<0.000000e+00> : vector<8x32xf32>
    %50 = tpu.matmul %46, %49, %cst_30 {dimension_numbers = #tpu.dot_dimension_numbers<[1], [0], [0], [1], [0, 0, 1, 1], [], []>} : vector<8x128xbf16>, vector<128x32xbf16>, vector<8x32xf32> -> vector<8x32xf32>
    %51 = arith.truncf %50 : vector<8x32xf32> to vector<8x32xbf16>
    %c0_31 = arith.constant 0 : index
    %c0_32 = arith.constant 0 : index
    %52 = vector.load %arg9[%c0_31, %c0_32] : memref<32x128xbf16, #tpu.memory_space<vmem>>, vector<32x128xbf16>
    %cst_33 = arith.constant dense<0.000000e+00> : vector<8x128xf32>
    %53 = tpu.matmul %51, %52, %cst_33 {dimension_numbers = #tpu.dot_dimension_numbers<[1], [0], [0], [1], [0, 0, 1, 1], [], []>} : vector<8x32xbf16>, vector<32x128xbf16>, vector<8x128xf32> -> vector<8x128xf32>
    %c0_34 = arith.constant 0 : index
    %c0_35 = arith.constant 0 : index
    %54 = vector.load %arg10[%c0_34, %c0_35] : memref<1x128xf32, #tpu.memory_space<vmem>>, vector<1x128xf32>
    %55 = vector.broadcast %54 : vector<1x128xf32> to vector<8x128xf32>
    %56 = arith.addf %53, %55 : vector<8x128xf32>
    %c0_36 = arith.constant 0 : index
    %c0_37 = arith.constant 0 : index
    %57 = vector.load %arg11[%c0_36, %c0_37] : memref<8x128xf32, #tpu.memory_space<vmem>>, vector<8x128xf32>
    tpu.vector_store %arg11[%c0_36, %c0_37], %56 {strides = array<i32>} : memref<8x128xf32, #tpu.memory_space<vmem>>, vector<8x128xf32>,
    return
  }
  func.func @transform_0(%arg0: i32) -> (i32, i32, i32) {
    %c0_i32 = arith.constant 0 : i32
    %c0_i32_0 = arith.constant 0 : i32
    %c0_i32_1 = arith.constant 0 : i32
    return %arg0, %c0_i32, %c0_i32_0 : i32, i32, i32
  }
  func.func @transform_1(%arg0: i32) -> (i32, i32, i32) {
    %c0_i32 = arith.constant 0 : i32
    %c0_i32_0 = arith.constant 0 : i32
    %c0_i32_1 = arith.constant 0 : i32
    return %arg0, %c0_i32, %c0_i32_0 : i32, i32, i32
  }
  func.func @transform_2(%arg0: i32) -> (i32, i32) {
    %c0_i32 = arith.constant 0 : i32
    %c0_i32_0 = arith.constant 0 : i32
    %c0_i32_1 = arith.constant 0 : i32
    return %c0_i32, %c0_i32_0 : i32, i32
  }
  func.func @transform_3(%arg0: i32) -> (i32, i32) {
    %c0_i32 = arith.constant 0 : i32
    %c0_i32_0 = arith.constant 0 : i32
    %c0_i32_1 = arith.constant 0 : i32
    return %c0_i32, %c0_i32_0 : i32, i32
  }
  func.func @transform_4(%arg0: i32) -> (i32, i32) {
    %c0_i32 = arith.constant 0 : i32
    %c0_i32_0 = arith.constant 0 : i32
    %c0_i32_1 = arith.constant 0 : i32
    return %c0_i32, %c0_i32_0 : i32, i32
  }
  func.func @transform_5(%arg0: i32) -> (i32, i32) {
    %c0_i32 = arith.constant 0 : i32
    %c0_i32_0 = arith.constant 0 : i32
    %c0_i32_1 = arith.constant 0 : i32
    return %c0_i32, %c0_i32_0 : i32, i32
  }
  func.func @transform_6(%arg0: i32) -> (i32, i32) {
    %c0_i32 = arith.constant 0 : i32
    %c0_i32_0 = arith.constant 0 : i32
    %c0_i32_1 = arith.constant 0 : i32
    return %c0_i32, %c0_i32_0 : i32, i32
  }
  func.func @transform_7(%arg0: i32) -> (i32, i32) {
    %c0_i32 = arith.constant 0 : i32
    %c0_i32_0 = arith.constant 0 : i32
    %c0_i32_1 = arith.constant 0 : i32
    return %c0_i32, %c0_i32_0 : i32, i32
  }
  func.func @transform_8(%arg0: i32) -> (i32, i32) {
    %c0_i32 = arith.constant 0 : i32
    %c0_i32_0 = arith.constant 0 : i32
    %c0_i32_1 = arith.constant 0 : i32
    return %c0_i32, %c0_i32_0 : i32, i32
  }
  func.func @transform_9(%arg0: i32) -> (i32, i32) {
    %c0_i32 = arith.constant 0 : i32
    %c0_i32_0 = arith.constant 0 : i32
    %c0_i32_1 = arith.constant 0 : i32
    return %c0_i32, %c0_i32_0 : i32, i32
  }
  func.func @transform_10(%arg0: i32) -> (i32, i32) {
    %c0_i32 = arith.constant 0 : i32
    %c0_i32_0 = arith.constant 0 : i32
    return %arg0, %c0_i32 : i32, i32
  }
}

</mosaic_0001>

<bundles_post_ra>
// kernel: tpu_custom_call.1
= control target key start
LH: loop header
LB: loop body
LE: loop exit
PB: predicated region body
PF: predicated region fallthrough
CT: control target
= control target key end

     0   :  { %s2256_s0 = inlined_call_operand.vmem [shape: bf16[2,128,128], index: 0, kind: input, shape index: {}]   ;;  %s2257_s1 = inlined_call_operand.vmem [shape: f32[2,128,2], index: 1, kind: input, shape index: {}]   ;;  %s2258_s2 = inlined_call_operand.vmem [shape: bf16[8,128], index: 2, kind: input, shape index: {}]   ;;  %s2259_s3 = inlined_call_operand.vmem [shape: f32[3,32], index: 3, kind: input, shape index: {}]   ;;  %s2260_s4 = inlined_call_operand.vmem [shape: bf16[64,32], index: 4, kind: input, shape index: {}]   ;;  %s2261_s5 = inlined_call_operand.vmem [shape: f32[1,32], index: 5, kind: input, shape index: {}]   ;;  %s2262_s6 = inlined_call_operand.vmem [shape: bf16[64,32], index: 6, kind: input, shape index: {}]   ;;  %s2263_s7 = inlined_call_operand.vmem [shape: f32[1,32], index: 7, kind: input, shape index: {}]   ;;  %s2264_s8 = inlined_call_operand.vmem [shape: bf16[32,128], index: 8, kind: input, shape index: {}]   ;;  %s2265_s9 = inlined_call_operand.vmem [shape: f32[1,128], index: 9, kind: input, shape index: {}]   ;;  %s2266_s10 = inlined_call_operand.hbm [shape: f32[16,128], index: 10, kind: output, shape index: {}]  }
   0x1   :  { %2267 = sst [smem:[#allocation5_spill]] %s2256_s0 }
   0x2   :  { %2268 = sst [smem:[#allocation6_spill]] %s2257_s1 }
   0x3   :  { %15 = vsyncpa [#allocation3], 0 }
   0x4   :  { %17 = vsyncpa [#allocation3 + $0x1], 0  ;;  %s1772_s13 = smov 0   ;;  %s1774_s14 = smov 0  }
   0x5   :  { %s1776_s15 = smov 0   ;;  %s1778_s16 = smov 0  }
   0x6 LB: > { %s1793_s17 = sadd.s32 4294967295, %s1713_s16   ;;  %s1452_s18 = sadd.s32 4294967294, %s1713_s16   ;;  %s1713_s16 = sphi %s1778_s16, %s2276_s16   ;;  %s1709_s15 = sphi %s1776_s15, %s2275_s15   ;;  %s1705_s14 = sphi %s1774_s14, %s2274_s14   ;;  %s1701_s13 = sphi %s1772_s13, %s2273_s13  }
   0x7   : > { %s1797_s19 = sadd.s32 1, %s1713_s16   ;;  %s250_s20 = sadd.s32 1, %s1709_s15 }
   0x8   : > { %s247_s21 = ssub.s32 %s1713_s16, %s1797_s19  ;;  %p260_p0 = scmp.ne.s32.totalorder %s1709_s15, %s1705_s14 }
   0x9   : > { %p248_p1 = scmp.eq.s32.totalorder %s247_s21, 0  ;;  %p261_p2 = scmp.eq.s32.totalorder %s1793_s17, 1 }
   0xa   : > { %p266_p3 = scmp.ne.s32.totalorder %s1705_s14, %s1701_s13  ;;  %p267_p4 = scmp.eq.s32.totalorder %s1452_s18, 1 }
   0xb   : > { %s1808_s22 = scalar_select %p248_p1, %s1709_s15, %s250_s20  }
   0xc   : > { %p1810_p5 = por %p261_p2, %p260_p0  ;;  %p1814_p6 = por %p267_p4, %p266_p3 }
   0xd   : > { %p1455_p7 = scmp.ge.s32.totalorder %s1713_s16, 1  ;;  %p325_p8 = scmp.lt.s32.totalorder %s1713_s16, 3 }
   0xf   : > { %p326_p9 = pnand %p1455_p7, %p325_p8 }
  0x10   : > { %p368_p10 = scmp.lt.s32.totalorder (!%p326_p9), %s1793_s17, 1  ;;  %s2271_s1 = sld [smem:[#allocation6_spill]] (!%p326_p9) }
  0x11   : > { %329 = sbr.rel (%p326_p9) target bundleno = 1556 (0x614), region = 60  ;;  %s2272_s0 = sld [smem:[#allocation5_spill]] (!%p326_p9) }
  0x12   : > { %s365_s18 = sand.u32 (!%p326_p9), 1, %s1705_s14  }
  0x13   : > { %s1456_s21 = sshll.u32 (!%p326_p9), %s365_s18, 3 }
  0x14   : > { %s367_s30 = scalar_lea.vmem (!%p326_p9), [#allocation2], %s1456_s21 }
  0x15   : > { %s1378_s11 = sshll.u32 (!%p326_p9), %s367_s30, 4  ;;  %s1379_s11 = int_to_ptr.vmem [resolvable:$true] %s1378_s11 }
  0x16   : > { %v1715_v0 = vmov 0   ;;  %s1822_s25 = scalar_select %p368_p10, %s1793_s17, 1  ;;  %v1897_v17 = vld [vmem:[%s2259_s3] ss:$0 sm:$0xff]  ;;  %v1645_v24 = vld [vmem:[%s2259_s3 + $0x1] ss:$0 sm:$0xff] }
  0x17   : > { %1641 = vset.pattern.permute.xlu2 %v1715_v0  ;;  %1640 = vset.pattern.permute.xlu1 %v1715_v0  ;;  %vm767_vm0 = vcmask 261120  }
  0x18   : > { %1639 = vset.pattern.permute.xlu0 %v1715_v0  ;;  %s1571_s26 = sshll.u32 %s1822_s25, 7  ;;  %s1570_s20 = sshll.u32 %s1822_s25, 6 }
  0x19   : > { %s1828_s29 = scalar_lea.vmem %s2271_s1, %s1571_s26  ;;  %s372_s27 = scalar_lea.vmem %s2272_s0, %s1570_s20 }
  0x1a   : > { %v1831_v1 = vld [vmem:[%s1828_s29 + $0x70] sm:$0xff]  ;;  %v1834_v2 = vld [vmem:[%s1828_s29 + $0x60] sm:$0xff]  ;;  %v1843_v4 = vld [vmem:[%s1828_s29 + $0x78] sm:$0xff]  ;;  %s1567_s20 = sshll.u32 %s1793_s17, 3  ;;  %s1366_s0 = scalar_lea.sflag [#allocation3], %s365_s18 }
  0x1b   : > { %v1837_v3 = vld [vmem:[%s1828_s29 + $0x50] sm:$0xff]  ;;  %486 = vperm.xlu0 %1639, %v1831_v1   ;;  %476 = vperm.xlu1 %1640, %v1834_v2   ;;  %v1846_v5 = vld [vmem:[%s1828_s29 + $0x68] sm:$0xff]  ;;  %v1849_v6 = vld [vmem:[%s1828_s29 + $0x58] sm:$0xff]  ;;  %s1376_s25 = scalar_lea.hbm %s2266_s10, %s1567_s20 }
  0x1c   : > { %466 = vperm.xlu2 %1641, %v1837_v3   ;;  %v1855_v7 = vld [vmem:[%s1828_s29 + $0x48] sm:$0xff]  ;;  %v1858_v8 = vld [vmem:[%s1828_s29 + $0x40] sm:$0xff]  ;;  %v1861_v9 = vld [vmem:[%s1828_s29 + $0x30] sm:$0xff]  ;;  %s1380_s12 = sshll.u32 %s1376_s25, 4  ;;  %s1381_s12 = int_to_ptr.hbm [resolvable:$true] %s1380_s12 }
  0x1d   : > { %v1867_v10 = vld [vmem:[%s1828_s29 + $0x38] sm:$0xff]  ;;  %v1870_v11 = vld [vmem:[%s1828_s29 + $0x20] sm:$0xff]  ;;  %v1873_v12 = vld [vmem:[%s1828_s29 + $0x28] sm:$0xff]  ;;  %s1665_s17 = sshra.s32 %s1381_s12, 4  ;;  %s1666_s17 = int_to_ptr.hbm [resolvable:$true] %s1665_s17 }
  0x1e   : > { %v1879_v13 = vld [vmem:[%s1828_s29 + $0x18] sm:$0xff]  ;;  %v1882_v14 = vld [vmem:[%s1828_s29 + $0x10] sm:$0xff]  ;;  %v1885_v15 = vld [vmem:[%s1828_s29] sm:$0xff]  ;;  %s1667_s1 = scalar_lea.hbm %s1666_s17, 8  ;;  %p1672_p0 = scmp.lt.s32.totalorder %s1666_s17, %s2266_s10 }
  0x1f   : > { %v1891_v16 = vld [vmem:[%s1828_s29 + $0x8] sm:$0xff]  ;;  %v1948_v63 = vld [vmem:[%s372_s27] sm:$0xff]  ;;  %v1950_v0 = vld [vmem:[%s372_s27 + $0x30] sm:$0xff]  ;;  %p1668_p11 = scmp.ne.s32.totalorder %s1666_s17, %s1667_s1 }
  0x21   : > { %p1669_p12 = pnand %p1668_p11, %p1810_p5 }
  0x23   : > { %491 = vperm.xlu0 %1639, %v1843_v4   ;;  %481 = vperm.xlu1 %1640, %v1846_v5   ;;  %p1670_p13 = pneg %p1669_p12 }
  0x24   : > { %471 = vperm.xlu2 %1641, %v1849_v6  }
  0x2b   : > { %461 = vperm.xlu1 %1640, %v1855_v7   ;;  %456 = vperm.xlu0 %1639, %v1858_v8  }
  0x2c   : > { %446 = vperm.xlu2 %1641, %v1861_v9  }
  0x33   : > { %451 = vperm.xlu0 %1639, %v1867_v10   ;;  %436 = vperm.xlu1 %1640, %v1870_v11  }
  0x34   : > { %441 = vperm.xlu2 %1641, %v1873_v12  }
  0x3b   : > { %431 = vperm.xlu1 %1640, %v1879_v13   ;;  %426 = vperm.xlu0 %1639, %v1882_v14  }
  0x3c   : > { %416 = vperm.xlu2 %1641, %v1885_v15  }
  0x43   : > { %421 = vperm.xlu0 %1639, %v1891_v16  }
  0x76   : > { %v467_v18 = vpop.permute.xlu2 %466 }
  0x77   : > { %v1900_v19 = vmul.f32 %v1897_v17, %v467_v18  ;;  %v505_v32 = vmul.f32 %v1645_v24, %v467_v18  ;;  %v1954_v18 = vld [vmem:[%s372_s27 + $0x8] sm:$0xff] }
  0x7e   : > { %v472_v20 = vpop.permute.xlu2 %471 }
  0x7f   : > { %v1903_v21 = vmul.f32 %v1897_v17, %v472_v20  ;;  %v506_v33 = vmul.f32 %v1645_v24, %v472_v20  ;;  %v1956_v20 = vld [vmem:[%s372_s27 + $0x38] sm:$0xff] }
  0x81   : > { %v516_v42 = vpack.c.bf16 %v506_v33, %v505_v32 }
  0x86   : > { %v1926_v39 = vpop.permute.xlu2 %446 }
  0x87   : > { %v501_v46 = vmul.f32 %v1645_v24, %v1926_v39 }
  0x8d   : > { %v1905_v22 = vpop.permute.xlu0 %486  ;;  %v1907_v23 = vpop.permute.xlu1 %476 }
  0x8e   : > { %v509_v27 = vmul.f32 %v1645_v24, %v1905_v22  ;;  %v507_v31 = vmul.f32 %v1645_v24, %v1907_v23  ;;  %v1935_v50 = vpop.permute.xlu2 %441 }
  0x8f   : > { %v500_v51 = vmul.f32 %v1645_v24, %v1935_v50 }
  0x95   : > { %v1912_v25 = vpop.permute.xlu0 %491  ;;  %v1914_v26 = vpop.permute.xlu1 %481 }
  0x96   : > { %v510_v28 = vmul.f32 %v1645_v24, %v1912_v25  ;;  %v508_v29 = vmul.f32 %v1645_v24, %v1914_v26  ;;  %v417_v58 = vpop.permute.xlu2 %416 }
  0x97   : > { %v495_v60 = vmul.f32 %v1645_v24, %v417_v58 }
  0x98   : > { %v518_v30 = vpack.c.bf16 %v510_v28, %v509_v27  ;;  %v517_v34 = vpack.c.bf16 %v508_v29, %v507_v31  ;;  %v1963_v27 = vld [vmem:[%s372_s27 + $0x18] sm:$0xff]  ;;  %v1966_v28 = vld [vmem:[%s372_s27 + $0x20] sm:$0xff]  ;;  %v1969_v29 = vld [vmem:[%s372_s27 + $0x28] sm:$0xff] }
  0x99   : > { %v1580_v31 = vld [vmem:[%s2260_s4] sm:$0xff] }
  0x9a   : > { %567 = vmatpush.bf16.msra.mxu0 %v518_v30  ;;  %1590 = vmatpush.bf16.msra.mxu1 %v518_v30  ;;  %v1581_v30 = vld [vmem:[%s2260_s4 + $0x8] sm:$0xff] }
  0x9b   : > { %883 = vmatpush.bf16.msra.mxu3 %v1581_v30  ;;  %v631_v30 = vmul.f32 %v1897_v17, %v1905_v22 }
  0x9d   : > { %v462_v35 = vpop.permute.xlu1 %461  ;;  %v457_v36 = vpop.permute.xlu0 %456 }
  0x9e   : > { %v1921_v37 = vmul.f32 %v1897_v17, %v462_v35  ;;  %v1924_v38 = vmul.f32 %v1897_v17, %v457_v36  ;;  %568 = vmatpush.bf16.msra.mxu0 %v517_v34  ;;  %1591 = vmatpush.bf16.msra.mxu1 %v517_v34  ;;  %v504_v40 = vmul.f32 %v1645_v24, %v462_v35 }
  0x9f   : > { %v503_v41 = vmul.f32 %v1645_v24, %v457_v36  ;;  %884 = vmatpush.bf16.msra.mxu3 %v1580_v31  ;;  %v629_v34 = vmul.f32 %v1897_v17, %v1907_v23  ;;  %v617_v35 = vmul.f32 %v1897_v17, %v417_v58 }
  0xa1   : > { %v515_v43 = vpack.c.bf16 %v504_v40, %v503_v41  ;;  %v1984_v40 = vld [vmem:[%s2259_s3 + $0x2] ss:$0 sm:$0xff] }
  0xa2   : > { %569 = vmatpush.bf16.msra.mxu0 %v516_v42  ;;  %1592 = vmatpush.bf16.msra.mxu1 %v516_v42  ;;  %v630_v42 = vmul.f32 %v1897_v17, %v1914_v26 }
  0xa5   : > { %v1928_v44 = vpop.permute.xlu0 %451  ;;  %v1930_v45 = vpop.permute.xlu1 %436 }
  0xa6   : > { %v502_v47 = vmul.f32 %v1645_v24, %v1928_v44  ;;  %570 = vmatpush.bf16.msra.mxu0 %v515_v43  ;;  %1593 = vmatpush.bf16.msra.mxu1 %v515_v43  ;;  %v499_v48 = vmul.f32 %v1645_v24, %v1930_v45 }
  0xa8   : > { %v514_v49 = vpack.c.bf16 %v502_v47, %v501_v46  ;;  %v513_v52 = vpack.c.bf16 %v500_v51, %v499_v48 }
  0xaa   : > { %571 = vmatpush.bf16.msra.mxu0 %v514_v49  ;;  %1594 = vmatpush.bf16.msra.mxu1 %v514_v49 }
  0xad   : > { %v1938_v53 = vpop.permute.xlu1 %431  ;;  %v1940_v54 = vpop.permute.xlu0 %426 }
  0xae   : > { %v498_v55 = vmul.f32 %v1645_v24, %v1938_v53  ;;  %v497_v56 = vmul.f32 %v1645_v24, %v1940_v54  ;;  %572 = vmatpush.bf16.msra.mxu0 %v513_v52  ;;  %1595 = vmatpush.bf16.msra.mxu1 %v513_v52  ;;  %v619_v31 = vmul.f32 %v1897_v17, %v1940_v54 }
  0xb0   : > { %v512_v57 = vpack.c.bf16 %v498_v55, %v497_v56 }
  0xb2   : > { %573 = vmatpush.bf16.msra.mxu0 %v512_v57  ;;  %1596 = vmatpush.bf16.msra.mxu1 %v512_v57 }
  0xb5   : > { %v422_v59 = vpop.permute.xlu0 %421 }
  0xb6   : > { %v496_v61 = vmul.f32 %v1645_v24, %v422_v59  ;;  %v1960_v24 = vld [vmem:[%s372_s27 + $0x10] sm:$0xff]  ;;  %v618_v43 = vmul.f32 %v1897_v17, %v422_v59  ;;  %s1671_s27 = scalar_lea.hbm %s2266_s10, 16 }
  0xb7   : > { %p1673_p1 = scmp.lt.s32.totalorder %s1671_s27, %s1667_s1 }
  0xb8   : > { %v511_v62 = vpack.c.bf16 %v496_v61, %v495_v60 }
  0xb9   : > { %p1674_p2 = por %p1673_p1, %p1672_p0 }
  0xba   : > { %574 = vmatpush.bf16.msra.mxu0 %v511_v62  ;;  %1597 = vmatpush.bf16.msra.mxu1 %v511_v62 }
  0xbb   : > { %p1675_p3 = pnand %p1674_p2, %p1670_p13 }
  0xbd   : > { %575 = vmatmul.bf16.vlgmr.msra.gmra.mxu0 %v1948_v63  ;;  %605 = vmatmul.bf16.vlgmr.msra.gmra.mxu1 %v1950_v0 }
  0xcd   : > { %580 = vmatmul.bf16.gmra.mxu0 %v1954_v18  ;;  %610 = vmatmul.bf16.gmra.mxu1 %v1956_v20 }
  0xdd   : > { %585 = vmatmul.bf16.gmra.mxu0 %v1960_v24 }
  0xed   : > { %590 = vmatmul.bf16.gmra.mxu0 %v1963_v27 }
  0xfd   : > { %595 = vmatmul.bf16.gmra.mxu0 %v1966_v28 }
 0x10d   : > { %600 = vmatmul.bf16.gmra.mxu0 %v1969_v29 }
 0x13a   : > { %v576_v32 = vpop.f32.mrf.mxu0  ;;  %v606_v33 = vpop.f32.mrf.mxu1 }
 0x13b   : > { %v633_v36 = vadd.f32 %v617_v35, %v576_v32  ;;  %v645_v41 = vadd.f32 %v629_v34, %v606_v33  ;;  %v632_v34 = vmul.f32 %v1897_v17, %v1912_v25  ;;  %v620_v35 = vmul.f32 %v1897_v17, %v1938_v53 }
 0x13c   : > { %v621_v53 = vmul.f32 %v1897_v17, %v1930_v45  ;;  %v623_v45 = vmul.f32 %v1897_v17, %v1926_v39 }
 0x13d   : > { %v650_v48 = vadd.f32 %v1984_v40, %v633_v36  ;;  %v662_v23 = vadd.f32 %v1984_v40, %v645_v41 }
 0x13f   : > { %v666_v56 = vmax.f32 %v650_v48, 0.0  ;;  %v678_v57 = vmax.f32 %v662_v23, 0.0 }
 0x142   : > { %v578_v46 = vpop.f32.mrf.mxu0  ;;  %v608_v47 = vpop.f32.mrf.mxu1 }
 0x143   : > { %v634_v49 = vadd.f32 %v618_v43, %v578_v46  ;;  %v646_v51 = vadd.f32 %v630_v42, %v608_v47 }
 0x145   : > { %v651_v52 = vadd.f32 %v1984_v40, %v634_v49  ;;  %v663_v55 = vadd.f32 %v1984_v40, %v646_v51 }
 0x147   : > { %v667_v58 = vmax.f32 %v651_v52, 0.0  ;;  %v679_v60 = vmax.f32 %v663_v55, 0.0 }
 0x149   : > { %v1993_v26 = vpack.c.bf16 %v667_v58, %v666_v56  ;;  %v1995_v59 = vpack.c.bf16 %v679_v60, %v678_v57  ;;  %v622_v57 = vmul.f32 %v1897_v17, %v1935_v50 }
 0x14a   : > { %v581_v61 = vpop.f32.mrf.mxu0  ;;  %v611_v62 = vpop.f32.mrf.mxu1 }
 0x14b   : > { %1517 = vmatmul.msk.bf16.vlgmr.msra.gmra.mxu3 %vm767_vm0, %v1993_v26  ;;  %v635_v32 = vadd.f32 %v619_v31, %v581_v61  ;;  %v647_v33 = vadd.f32 %v631_v30, %v611_v62 }
 0x14d   : > { %v652_v42 = vadd.f32 %v1984_v40, %v635_v32  ;;  %v664_v43 = vadd.f32 %v1984_v40, %v647_v33 }
 0x14f   : > { %v668_v48 = vmax.f32 %v652_v42, 0.0  ;;  %v680_v23 = vmax.f32 %v664_v43, 0.0 }
 0x152   : > { %v583_v36 = vpop.f32.mrf.mxu0  ;;  %v613_v41 = vpop.f32.mrf.mxu1 }
 0x153   : > { %v636_v46 = vadd.f32 %v620_v35, %v583_v36  ;;  %v648_v47 = vadd.f32 %v632_v34, %v613_v41  ;;  %v624_v35 = vmul.f32 %v1897_v17, %v1928_v44 }
 0x155   : > { %v653_v22 = vadd.f32 %v1984_v40, %v636_v46  ;;  %v665_v54 = vadd.f32 %v1984_v40, %v648_v47 }
 0x157   : > { %v669_v49 = vmax.f32 %v653_v22, 0.0  ;;  %v681_v51 = vmax.f32 %v665_v54, 0.0 }
 0x159   : > { %v689_v25 = vpack.c.bf16 %v681_v51, %v680_v23  ;;  %v683_v52 = vpack.c.bf16 %v669_v49, %v668_v48 }
 0x15a   : > { %v586_v55 = vpop.f32.mrf.mxu0 }
 0x15b   : > { %690 = vmatpush.bf16.msrb.mxu1 %v689_v25  ;;  %1518 = vmatmul.msk.bf16.gmra.mxu3 %vm767_vm0, %v683_v52  ;;  %v637_v56 = vadd.f32 %v621_v53, %v586_v55 }
 0x15d   : > { %v654_v60 = vadd.f32 %v1984_v40, %v637_v56 }
 0x15f   : > { %691 = vmatpush.bf16.msrb.mxu1 %v1995_v59  ;;  %v670_v30 = vmax.f32 %v654_v60, 0.0 }
 0x162   : > { %v588_v58 = vpop.f32.mrf.mxu0 }
 0x163   : > { %v638_v61 = vadd.f32 %v622_v57, %v588_v58 }
 0x165   : > { %v655_v62 = vadd.f32 %v1984_v40, %v638_v61 }
 0x167   : > { %v671_v31 = vmax.f32 %v655_v62, 0.0 }
 0x169   : > { %v684_v32 = vpack.c.bf16 %v671_v31, %v670_v30 }
 0x16a   : > { %v591_v33 = vpop.f32.mrf.mxu0 }
 0x16b   : > { %1519 = vmatmul.msk.bf16.gmra.mxu3 %vm767_vm0, %v684_v32  ;;  %v639_v34 = vadd.f32 %v623_v45, %v591_v33 }
 0x16d   : > { %v656_v36 = vadd.f32 %v1984_v40, %v639_v34 }
 0x16f   : > { %v672_v43 = vmax.f32 %v656_v36, 0.0 }
 0x172   : > { %v593_v50 = vpop.f32.mrf.mxu0 }
 0x173   : > { %v640_v41 = vadd.f32 %v624_v35, %v593_v50 }
 0x175   : > { %v657_v42 = vadd.f32 %v1984_v40, %v640_v41 }
 0x177   : > { %v673_v46 = vmax.f32 %v657_v42, 0.0 }
 0x179   : > { %v685_v47 = vpack.c.bf16 %v673_v46, %v672_v43 }
 0x17a   : > { %v596_v22 = vpop.f32.mrf.mxu0 }
 0x17b   : > { %1520 = vmatmul.msk.bf16.gmra.mxu3 %vm767_vm0, %v685_v47  ;;  %v641_v54 = vadd.f32 %v1924_v38, %v596_v22 }
 0x17d   : > { %v658_v39 = vadd.f32 %v1984_v40, %v641_v54 }
 0x17f   : > { %v674_v44 = vmax.f32 %v658_v39, 0.0  ;;  %v1585_v39 = vld [vmem:[%s2262_s6 + $0x8] sm:$0xff] }
 0x180   : > { %1162 = vmatpush.bf16.msrb.mxu0 %v1585_v39 }
 0x182   : > { %v598_v48 = vpop.f32.mrf.mxu0 }
 0x183   : > { %v642_v23 = vadd.f32 %v1921_v37, %v598_v48 }
 0x185   : > { %v659_v17 = vadd.f32 %v1984_v40, %v642_v23 }
 0x187   : > { %v675_v49 = vmax.f32 %v659_v17, 0.0 }
 0x189   : > { %v686_v51 = vpack.c.bf16 %v675_v49, %v674_v44  ;;  %v1584_v49 = vld [vmem:[%s2262_s6] sm:$0xff] }
 0x18a   : > { %v601_v55 = vpop.f32.mrf.mxu0  ;;  %1163 = vmatpush.bf16.msrb.mxu0 %v1584_v49 }
 0x18b   : > { %1521 = vmatmul.msk.bf16.gmra.mxu3 %vm767_vm0, %v686_v51  ;;  %v643_v53 = vadd.f32 %v1900_v19, %v601_v55  ;;  %v1583_v19 = vld [vmem:[%s2260_s4 + $0x18] sm:$0xff] }
 0x18c   : > { %798 = vmatpush.bf16.msra.mxu2 %v1583_v19 }
 0x18d   : > { %v660_v57 = vadd.f32 %v1984_v40, %v643_v53 }
 0x18f   : > { %v676_v60 = vmax.f32 %v660_v57, 0.0  ;;  %v2072_v57 = vld [vmem:[%s2261_s5] ss:$0 sm:$0xff] }
 0x192   : > { %v603_v56 = vpop.f32.mrf.mxu0 }
 0x193   : > { %v644_v38 = vadd.f32 %v1903_v21, %v603_v56  ;;  %v1582_v21 = vld [vmem:[%s2260_s4 + $0x10] sm:$0xff] }
 0x194   : > { %799 = vmatpush.bf16.msra.mxu2 %v1582_v21 }
 0x195   : > { %v661_v58 = vadd.f32 %v1984_v40, %v644_v38 }
 0x197   : > { %v677_v61 = vmax.f32 %v661_v58, 0.0 }
 0x199   : > { %v687_v37 = vpack.c.bf16 %v677_v61, %v676_v60 }
 0x19b   : > { %692 = vmatpush.bf16.msrb.mxu1 %v687_v37  ;;  %1522 = vmatmul.msk.bf16.gmra.mxu3 %vm767_vm0, %v687_v37 }
 0x19f   : > { %693 = vmatpush.bf16.msrb.mxu1 %v686_v51 }
 0x1a3   : > { %694 = vmatpush.bf16.msrb.mxu1 %v685_v47 }
 0x1a7   : > { %695 = vmatpush.bf16.msrb.mxu1 %v684_v32 }
 0x1ab   : > { %696 = vmatpush.bf16.msrb.mxu1 %v683_v52  ;;  %1523 = vmatmul.msk.bf16.gmra.mxu3 %vm767_vm0, %v1995_v59 }
 0x1af   : > { %697 = vmatpush.bf16.msrb.mxu1 %v1993_v26 }
 0x1b2   : > { %698 = vmatmul.bf16.vlgmr.msrb.gmra.mxu1 %v1948_v63 }
 0x1bb   : > { %1524 = vmatmul.msk.bf16.gmra.mxu3 %vm767_vm0, %v689_v25 }
 0x1c2   : > { %703 = vmatmul.bf16.gmra.mxu1 %v1954_v18 }
 0x1ce   : > { %v886_v54 = vpop.f32.mrf.mxu3 }
 0x1d2   : > { %708 = vmatmul.bf16.gmra.mxu1 %v1960_v24 }
 0x1d6   : > { %v888_v44 = vpop.f32.mrf.mxu3 }
 0x1de   : > { %v891_v51 = vpop.f32.mrf.mxu3 }
 0x1e2   : > { %713 = vmatmul.bf16.gmra.mxu1 %v1963_v27 }
 0x1e6   : > { %v893_v55 = vpop.f32.mrf.mxu3 }
 0x1ee   : > { %v896_v61 = vpop.f32.mrf.mxu3 }
 0x1f2   : > { %718 = vmatmul.bf16.gmra.mxu1 %v1966_v28 }
 0x202   : > { %723 = vmatmul.bf16.gmra.mxu1 %v1969_v29 }
 0x212   : > { %728 = vmatmul.bf16.gmra.mxu1 %v1950_v0 }
 0x222   : > { %733 = vmatmul.bf16.gmra.mxu1 %v1956_v20 }
 0x22f   : > { %v699_v40 = vpop.f32.mrf.mxu1 }
 0x237   : > { %v701_v26 = vpop.f32.mrf.mxu1 }
 0x238   : > { %v743_v59 = vpack.c.bf16 %v701_v26, %v699_v40 }
 0x23a   : > { %1501 = vmatmul.msk.bf16.vlgmr.msra.gmra.mxu2 %vm767_vm0, %v743_v59  ;;  %v898_v59 = vpop.f32.mrf.mxu3 }
 0x23f   : > { %v704_v25 = vpop.f32.mrf.mxu1 }
 0x247   : > { %v706_v52 = vpop.f32.mrf.mxu1 }
 0x248   : > { %v744_v62 = vpack.c.bf16 %v706_v52, %v704_v25 }
 0x24a   : > { %1502 = vmatmul.msk.bf16.gmra.mxu2 %vm767_vm0, %v744_v62 }
 0x24f   : > { %v709_v30 = vpop.f32.mrf.mxu1 }
 0x257   : > { %v711_v31 = vpop.f32.mrf.mxu1 }
 0x258   : > { %v745_v32 = vpack.c.bf16 %v711_v31, %v709_v30 }
 0x25a   : > { %1503 = vmatmul.msk.bf16.gmra.mxu2 %vm767_vm0, %v745_v32 }
 0x25f   : > { %v714_v33 = vpop.f32.mrf.mxu1 }
 0x267   : > { %v716_v45 = vpop.f32.mrf.mxu1 }
 0x268   : > { %v746_v34 = vpack.c.bf16 %v716_v45, %v714_v33  ;;  %v901_v45 = vpop.f32.mrf.mxu3 }
 0x26a   : > { %1504 = vmatmul.msk.bf16.gmra.mxu2 %vm767_vm0, %v746_v34 }
 0x26f   : > { %v719_v35 = vpop.f32.mrf.mxu1 }
 0x277   : > { %v721_v50 = vpop.f32.mrf.mxu1 }
 0x278   : > { %v747_v36 = vpack.c.bf16 %v721_v50, %v719_v35 }
 0x27a   : > { %1505 = vmatmul.msk.bf16.gmra.mxu2 %vm767_vm0, %v747_v36  ;;  %v903_v36 = vpop.f32.mrf.mxu3 }
 0x27f   : > { %v724_v41 = vpop.f32.mrf.mxu1 }
 0x282   : > { %v906_v39 = vpop.f32.mrf.mxu3 }
 0x287   : > { %v726_v42 = vpop.f32.mrf.mxu1 }
 0x288   : > { %v748_v43 = vpack.c.bf16 %v726_v42, %v724_v41 }
 0x28a   : > { %1506 = vmatmul.msk.bf16.gmra.mxu2 %vm767_vm0, %v748_v43 }
 0x28f   : > { %v729_v46 = vpop.f32.mrf.mxu1 }
 0x297   : > { %v731_v47 = vpop.f32.mrf.mxu1 }
 0x298   : > { %v749_v22 = vpack.c.bf16 %v731_v47, %v729_v46 }
 0x29a   : > { %1507 = vmatmul.msk.bf16.gmra.mxu2 %vm767_vm0, %v749_v22 }
 0x29f   : > { %v734_v48 = vpop.f32.mrf.mxu1 }
 0x2a7   : > { %v736_v23 = vpop.f32.mrf.mxu1 }
 0x2a8   : > { %v750_v17 = vpack.c.bf16 %v736_v23, %v734_v48 }
 0x2aa   : > { %1508 = vmatmul.msk.bf16.gmra.mxu2 %vm767_vm0, %v750_v17 }
 0x2bd   : > { %v801_v53 = vpop.f32.mrf.mxu2 }
 0x2be   : > { %v887_v56 = vadd.f32 %v886_v54, %v801_v53 }
 0x2c0   : > { %v930_v58 = vadd.f32 %v2072_v57, %v887_v56 }
 0x2c2   : > { %v946_v19 = vmax.f32 %v930_v58, 0.0 }
 0x2c5   : > { %v803_v38 = vpop.f32.mrf.mxu2 }
 0x2c6   : > { %v889_v60 = vadd.f32 %v888_v44, %v803_v38 }
 0x2c8   : > { %v931_v37 = vadd.f32 %v2072_v57, %v889_v60 }
 0x2ca   : > { %v947_v21 = vmax.f32 %v931_v37, 0.0 }
 0x2cc   : > { %v2076_v40 = vpack.c.bf16 %v947_v21, %v946_v19 }
 0x2cd   : > { %v806_v26 = vpop.f32.mrf.mxu2 }
 0x2ce   : > { %1549 = vmatmul.msk.bf16.vlgmr.msrb.gmra.mxu0 %vm767_vm0, %v2076_v40  ;;  %v892_v25 = vadd.f32 %v891_v51, %v806_v26 }
 0x2d0   : > { %v932_v62 = vadd.f32 %v2072_v57, %v892_v25 }
 0x2d2   : > { %v948_v32 = vmax.f32 %v932_v62, 0.0 }
 0x2d5   : > { %v808_v52 = vpop.f32.mrf.mxu2 }
 0x2d6   : > { %v894_v30 = vadd.f32 %v893_v55, %v808_v52  ;;  %v908_v55 = vpop.f32.mrf.mxu3 }
 0x2d8   : > { %v933_v31 = vadd.f32 %v2072_v57, %v894_v30 }
 0x2da   : > { %v949_v33 = vmax.f32 %v933_v31, 0.0 }
 0x2dc   : > { %v2082_v34 = vpack.c.bf16 %v949_v33, %v948_v32 }
 0x2dd   : > { %v811_v35 = vpop.f32.mrf.mxu2 }
 0x2de   : > { %1550 = vmatmul.msk.bf16.gmra.mxu0 %vm767_vm0, %v2082_v34  ;;  %v897_v50 = vadd.f32 %v896_v61, %v811_v35  ;;  %v911_v61 = vpop.f32.mrf.mxu3 }
 0x2e0   : > { %v934_v42 = vadd.f32 %v2072_v57, %v897_v50 }
 0x2e2   : > { %v950_v47 = vmax.f32 %v934_v42, 0.0 }
 0x2e5   : > { %v813_v41 = vpop.f32.mrf.mxu2 }
 0x2e6   : > { %v899_v43 = vadd.f32 %v898_v59, %v813_v41  ;;  %v913_v62 = vpop.f32.mrf.mxu3 }
 0x2e8   : > { %v935_v46 = vadd.f32 %v2072_v57, %v899_v43 }
 0x2ea   : > { %v951_v22 = vmax.f32 %v935_v46, 0.0 }
 0x2ec   : > { %v2088_v54 = vpack.c.bf16 %v951_v22, %v950_v47 }
 0x2ed   : > { %v816_v48 = vpop.f32.mrf.mxu2 }
 0x2ee   : > { %1551 = vmatmul.msk.bf16.gmra.mxu0 %vm767_vm0, %v2088_v54  ;;  %v902_v23 = vadd.f32 %v901_v45, %v816_v48  ;;  %v916_v35 = vpop.f32.mrf.mxu3 }
 0x2f0   : > { %v936_v44 = vadd.f32 %v2072_v57, %v902_v23 }
 0x2f2   : > { %v952_v53 = vmax.f32 %v936_v44, 0.0 }
 0x2f5   : > { %v818_v17 = vpop.f32.mrf.mxu2 }
 0x2f6   : > { %v904_v49 = vadd.f32 %v903_v36, %v818_v17  ;;  %v918_v46 = vpop.f32.mrf.mxu3 }
 0x2f8   : > { %v937_v51 = vadd.f32 %v2072_v57, %v904_v49 }
 0x2fa   : > { %v953_v56 = vmax.f32 %v937_v51, 0.0 }
 0x2fc   : > { %v965_v38 = vpack.c.bf16 %v953_v56, %v952_v53 }
 0x2fd   : > { %v821_v58 = vpop.f32.mrf.mxu2 }
 0x2fe   : > { %1552 = vmatmul.msk.bf16.gmra.mxu0 %vm767_vm0, %v965_v38  ;;  %v907_v60 = vadd.f32 %v906_v39, %v821_v58  ;;  %v921_v49 = vpop.f32.mrf.mxu3 }
 0x300   : > { %v938_v19 = vadd.f32 %v2072_v57, %v907_v60 }
 0x302   : > { %v954_v59 = vmax.f32 %v938_v19, 0.0 }
 0x305   : > { %v823_v37 = vpop.f32.mrf.mxu2 }
 0x306   : > { %v909_v21 = vadd.f32 %v908_v55, %v823_v37  ;;  %v923_v56 = vpop.f32.mrf.mxu3 }
 0x308   : > { %v939_v26 = vadd.f32 %v2072_v57, %v909_v21 }
 0x30a   : > { %v955_v25 = vmax.f32 %v939_v26, 0.0 }
 0x30c   : > { %v966_v52 = vpack.c.bf16 %v955_v25, %v954_v59 }
 0x30d   : > { %v826_v30 = vpop.f32.mrf.mxu2 }
 0x30e   : > { %1553 = vmatmul.msk.bf16.gmra.mxu0 %vm767_vm0, %v966_v52  ;;  %v912_v31 = vadd.f32 %v911_v61, %v826_v30 }
 0x310   : > { %v940_v33 = vadd.f32 %v2072_v57, %v912_v31 }
 0x312   : > { %v956_v36 = vmax.f32 %v940_v33, 0.0 }
 0x315   : > { %v828_v32 = vpop.f32.mrf.mxu2 }
 0x316   : > { %v914_v45 = vadd.f32 %v913_v62, %v828_v32 }
 0x318   : > { %v941_v50 = vadd.f32 %v2072_v57, %v914_v45 }
 0x31a   : > { %v957_v41 = vmax.f32 %v941_v50, 0.0 }
 0x31c   : > { %v967_v42 = vpack.c.bf16 %v957_v41, %v956_v36 }
 0x31d   : > { %v831_v43 = vpop.f32.mrf.mxu2 }
 0x31e   : > { %1554 = vmatmul.msk.bf16.gmra.mxu0 %vm767_vm0, %v967_v42  ;;  %v917_v47 = vadd.f32 %v916_v35, %v831_v43 }
 0x320   : > { %v942_v48 = vadd.f32 %v2072_v57, %v917_v47 }
 0x322   : > { %v958_v17 = vmax.f32 %v942_v48, 0.0 }
 0x325   : > { %v833_v22 = vpop.f32.mrf.mxu2 }
 0x326   : > { %v919_v39 = vadd.f32 %v918_v46, %v833_v22  ;;  %v2165_v46 = vld [vmem:[%s2263_s7] ss:$0 sm:$0xff] }
 0x328   : > { %v943_v23 = vadd.f32 %v2072_v57, %v919_v39 }
 0x32a   : > { %v959_v44 = vmax.f32 %v943_v23, 0.0 }
 0x32c   : > { %v968_v51 = vpack.c.bf16 %v959_v44, %v958_v17 }
 0x32d   : > { %v836_v55 = vpop.f32.mrf.mxu2 }
 0x32e   : > { %1555 = vmatmul.msk.bf16.gmra.mxu0 %vm767_vm0, %v968_v51  ;;  %v922_v53 = vadd.f32 %v921_v49, %v836_v55 }
 0x330   : > { %v944_v60 = vadd.f32 %v2072_v57, %v922_v53 }
 0x332   : > { %v960_v19 = vmax.f32 %v944_v60, 0.0 }
 0x335   : > { %v838_v58 = vpop.f32.mrf.mxu2 }
 0x336   : > { %v924_v61 = vadd.f32 %v923_v56, %v838_v58 }
 0x338   : > { %v945_v37 = vadd.f32 %v2072_v57, %v924_v61  ;;  %v1587_v57 = vld [vmem:[%s2262_s6 + $0x18] sm:$0xff] }
 0x339   : > { %1077 = vmatpush.bf16.msrb.mxu3 %v1587_v57 }
 0x33a   : > { %v961_v21 = vmax.f32 %v945_v37, 0.0 }
 0x33c   : > { %v969_v26 = vpack.c.bf16 %v961_v21, %v960_v19 }
 0x33e   : > { %970 = vmatpush.bf16.msrb.mxu2 %v969_v26  ;;  %1556 = vmatmul.msk.bf16.gmra.mxu0 %vm767_vm0, %v969_v26 }
 0x342   : > { %971 = vmatpush.bf16.msrb.mxu2 %v968_v51 }
 0x346   : > { %972 = vmatpush.bf16.msrb.mxu2 %v967_v42 }
 0x34a   : > { %973 = vmatpush.bf16.msrb.mxu2 %v966_v52 }
 0x34e   : > { %974 = vmatpush.bf16.msrb.mxu2 %v965_v38 }
 0x352   : > { %975 = vmatpush.bf16.msrb.mxu2 %v2088_v54 }
 0x356   : > { %976 = vmatpush.bf16.msrb.mxu2 %v2082_v34  ;;  %v1716_v34 = vmov 1  }
 0x357   : > { %1642 = vset.pattern.permute.xlu1 %v1716_v34  ;;  %1643 = vset.pattern.permute.xlu2 %v1716_v34 }
 0x358   : > { %1283 = vperm.xlu1 %1642, %v1831_v1   ;;  %1287 = vperm.xlu2 %1643, %v1843_v4   ;;  %v1586_v1 = vld [vmem:[%s2262_s6 + $0x10] sm:$0xff] }
 0x359   : > { %1644 = vset.pattern.permute.xlu0 %v1716_v34  ;;  %1078 = vmatpush.bf16.msrb.mxu3 %v1586_v1 }
 0x35a   : > { %977 = vmatpush.bf16.msrb.mxu2 %v2076_v40  ;;  %1275 = vperm.xlu0 %1644, %v1834_v2   ;;  %v1165_v40 = vpop.f32.mrf.mxu0 }
 0x35d   : > { %978 = vmatmul.bf16.vlgmr.msrb.gmra.mxu2 %v1948_v63 }
 0x360   : > { %1279 = vperm.xlu1 %1642, %v1846_v5   ;;  %1267 = vperm.xlu2 %1643, %v1837_v3  }
 0x362   : > { %1263 = vperm.xlu0 %1644, %v1855_v7   ;;  %v1167_v52 = vpop.f32.mrf.mxu0 }
 0x368   : > { %1271 = vperm.xlu1 %1642, %v1849_v6   ;;  %1259 = vperm.xlu2 %1643, %v1858_v8  }
 0x36a   : > { %1243 = vperm.xlu0 %1644, %v1870_v11   ;;  %v1170_v32 = vpop.f32.mrf.mxu0 }
 0x36d   : > { %983 = vmatmul.bf16.gmra.mxu2 %v1954_v18 }
 0x370   : > { %1251 = vperm.xlu1 %1642, %v1861_v9   ;;  %1255 = vperm.xlu2 %1643, %v1867_v10  }
 0x372   : > { %1239 = vperm.xlu0 %1644, %v1879_v13   ;;  %v1172_v50 = vpop.f32.mrf.mxu0 }
 0x378   : > { %1247 = vperm.xlu1 %1642, %v1873_v12   ;;  %1235 = vperm.xlu2 %1643, %v1882_v14  }
 0x37a   : > { %v1175_v48 = vpop.f32.mrf.mxu0 }
 0x37d   : > { %988 = vmatmul.bf16.gmra.mxu2 %v1960_v24 }
 0x380   : > { %1227 = vperm.xlu1 %1642, %v1885_v15   ;;  %1231 = vperm.xlu2 %1643, %v1891_v16  }
 0x382   : > { %v1177_v60 = vpop.f32.mrf.mxu0 }
 0x38d   : > { %993 = vmatmul.bf16.gmra.mxu2 %v1963_v27 }
 0x39d   : > { %998 = vmatmul.bf16.gmra.mxu2 %v1966_v28 }
 0x3ad   : > { %1003 = vmatmul.bf16.gmra.mxu2 %v1969_v29 }
 0x3b2   : > { %v2148_v27 = vpop.permute.xlu2 %1287 }
 0x3ba   : > { %v2153_v59 = vpop.permute.xlu2 %1267 }
 0x3bd   : > { %1008 = vmatmul.bf16.gmra.mxu2 %v1950_v0 }
 0x3c2   : > { %v2157_v31 = vpop.permute.xlu2 %1259 }
 0x3ca   : > { %v2146_v24 = vpop.permute.xlu1 %1283  ;;  %v1256_v45 = vpop.permute.xlu2 %1255 }
 0x3cc   : > { %v2160_v35 = vpop.permute.xlu0 %1275 }
 0x3cd   : > { %1013 = vmatmul.bf16.gmra.mxu2 %v1956_v20 }
 0x3d2   : > { %v2151_v54 = vpop.permute.xlu1 %1279  ;;  %v1236_v42 = vpop.permute.xlu2 %1235 }
 0x3d4   : > { %v2167_v47 = vpop.permute.xlu0 %1263 }
 0x3da   : > { %v2155_v30 = vpop.permute.xlu1 %1271  ;;  %v1232_v44 = vpop.permute.xlu2 %1231 }
 0x3dc   : > { %v1244_v58 = vpop.permute.xlu0 %1243 }
 0x3e0   : > { %v979_v2 = vpop.f32.mrf.mxu2 }
 0x3e2   : > { %v1252_v33 = vpop.permute.xlu1 %1251 }
 0x3e4   : > { %v1240_v26 = vpop.permute.xlu0 %1239 }
 0x3e8   : > { %v981_v3 = vpop.f32.mrf.mxu2 }
 0x3e9   : > { %v1023_v4 = vpack.c.bf16 %v981_v3, %v979_v2  ;;  %v1180_v2 = vpop.f32.mrf.mxu0 }
 0x3ea   : > { %v1248_v36 = vpop.permute.xlu1 %1247 }
 0x3eb   : > { %1533 = vmatmul.msk.bf16.vlgmr.msrb.gmra.mxu3 %vm767_vm0, %v1023_v4 }
 0x3f0   : > { %v984_v5 = vpop.f32.mrf.mxu2 }
 0x3f2   : > { %v1228_v17 = vpop.permute.xlu1 %1227 }
 0x3f8   : > { %v986_v6 = vpop.f32.mrf.mxu2 }
 0x3f9   : > { %v1024_v7 = vpack.c.bf16 %v986_v6, %v984_v5  ;;  %v1182_v6 = vpop.f32.mrf.mxu0 }
 0x3fb   : > { %1534 = vmatmul.msk.bf16.gmra.mxu3 %vm767_vm0, %v1024_v7 }
 0x400   : > { %v989_v8 = vpop.f32.mrf.mxu2 }
 0x408   : > { %v991_v9 = vpop.f32.mrf.mxu2 }
 0x409   : > { %v1025_v10 = vpack.c.bf16 %v991_v9, %v989_v8 }
 0x40b   : > { %1535 = vmatmul.msk.bf16.gmra.mxu3 %vm767_vm0, %v1025_v10 }
 0x410   : > { %v994_v11 = vpop.f32.mrf.mxu2 }
 0x418   : > { %v996_v12 = vpop.f32.mrf.mxu2 }
 0x419   : > { %v1026_v13 = vpack.c.bf16 %v996_v12, %v994_v11 }
 0x41b   : > { %1536 = vmatmul.msk.bf16.gmra.mxu3 %vm767_vm0, %v1026_v13 }
 0x420   : > { %v999_v14 = vpop.f32.mrf.mxu2 }
 0x428   : > { %v1001_v15 = vpop.f32.mrf.mxu2 }
 0x429   : > { %v1027_v16 = vpack.c.bf16 %v1001_v15, %v999_v14  ;;  %v1185_v15 = vpop.f32.mrf.mxu0 }
 0x42b   : > { %1537 = vmatmul.msk.bf16.gmra.mxu3 %vm767_vm0, %v1027_v16 }
 0x430   : > { %v1004_v63 = vpop.f32.mrf.mxu2 }
 0x438   : > { %v1006_v0 = vpop.f32.mrf.mxu2 }
 0x439   : > { %v1028_v18 = vpack.c.bf16 %v1006_v0, %v1004_v63 }
 0x43b   : > { %1538 = vmatmul.msk.bf16.gmra.mxu3 %vm767_vm0, %v1028_v18 }
 0x440   : > { %v1009_v20 = vpop.f32.mrf.mxu2 }
 0x448   : > { %v1011_v28 = vpop.f32.mrf.mxu2 }
 0x449   : > { %v1029_v29 = vpack.c.bf16 %v1011_v28, %v1009_v20  ;;  %v1187_v28 = vpop.f32.mrf.mxu0 }
 0x44b   : > { %1539 = vmatmul.msk.bf16.gmra.mxu3 %vm767_vm0, %v1029_v29 }
 0x450   : > { %v1014_v38 = vpop.f32.mrf.mxu2 }
 0x458   : > { %v1016_v25 = vpop.f32.mrf.mxu2 }
 0x459   : > { %v1030_v62 = vpack.c.bf16 %v1016_v25, %v1014_v38 }
 0x45b   : > { %1540 = vmatmul.msk.bf16.gmra.mxu3 %vm767_vm0, %v1030_v62  ;;  %v1190_v62 = vpop.f32.mrf.mxu0 }
 0x46e   : > { %v1080_v41 = vpop.f32.mrf.mxu3 }
 0x46f   : > { %v1166_v43 = vadd.f32 %v1165_v40, %v1080_v41 }
 0x471   : > { %v1209_v39 = vadd.f32 %v2165_v46, %v1166_v43 }
 0x473   : > { %v2171_v51 = vmul.f32 %v1228_v17, %v1209_v39 }
 0x476   : > { %v1082_v22 = vpop.f32.mrf.mxu3 }
 0x477   : > { %v1168_v23 = vadd.f32 %v1167_v52, %v1082_v22 }
 0x479   : > { %v1210_v49 = vadd.f32 %v2165_v46, %v1168_v23 }
 0x47b   : > { %v2173_v55 = vmul.f32 %v1232_v44, %v1210_v49 }
 0x47d   : > { %v1306_v53 = vpack.c.bf16 %v2173_v55, %v2171_v51  ;;  %v1650_v51 = vld [vmem:[%s2265_s9] ss:$0 sm:$0xff] }
 0x47e   : > { %v1085_v56 = vpop.f32.mrf.mxu3 }
 0x47f   : > { %v1171_v61 = vadd.f32 %v1170_v32, %v1085_v56 }
 0x481   : > { %v1211_v19 = vadd.f32 %v2165_v46, %v1171_v61 }
 0x483   : > { %v2179_v34 = vmul.f32 %v1236_v42, %v1211_v19 }
 0x486   : > { %v1087_v37 = vpop.f32.mrf.mxu3 }
 0x487   : > { %v1173_v21 = vadd.f32 %v1172_v50, %v1087_v37  ;;  %v1192_v50 = vpop.f32.mrf.mxu0 }
 0x489   : > { %v1212_v57 = vadd.f32 %v2165_v46, %v1173_v21 }
 0x48b   : > { %v2181_v1 = vmul.f32 %v1240_v26, %v1212_v57 }
 0x48d   : > { %v1307_v3 = vpack.c.bf16 %v2181_v1, %v2179_v34 }
 0x48e   : > { %v1090_v4 = vpop.f32.mrf.mxu3 }
 0x48f   : > { %v1176_v5 = vadd.f32 %v1175_v48, %v1090_v4  ;;  %v1195_v42 = vpop.f32.mrf.mxu0 }
 0x491   : > { %v1213_v8 = vadd.f32 %v2165_v46, %v1176_v5 }
 0x493   : > { %v1294_v11 = vmul.f32 %v1244_v58, %v1213_v8 }
 0x496   : > { %v1092_v7 = vpop.f32.mrf.mxu3 }
 0x497   : > { %v1178_v9 = vadd.f32 %v1177_v60, %v1092_v7  ;;  %v1197_v22 = vpop.f32.mrf.mxu0 }
 0x499   : > { %v1214_v10 = vadd.f32 %v2165_v46, %v1178_v9 }
 0x49b   : > { %v1295_v12 = vmul.f32 %v1248_v36, %v1214_v10 }
 0x49d   : > { %v1308_v13 = vpack.c.bf16 %v1295_v12, %v1294_v11 }
 0x49e   : > { %v1095_v14 = vpop.f32.mrf.mxu3 }
 0x49f   : > { %v1181_v16 = vadd.f32 %v1180_v2, %v1095_v14  ;;  %v1200_v39 = vpop.f32.mrf.mxu0 }
 0x4a1   : > { %v1215_v0 = vadd.f32 %v2165_v46, %v1181_v16 }
 0x4a3   : > { %v1296_v29 = vmul.f32 %v1252_v33, %v1215_v0 }
 0x4a6   : > { %v1097_v63 = vpop.f32.mrf.mxu3 }
 0x4a7   : > { %v1183_v18 = vadd.f32 %v1182_v6, %v1097_v63  ;;  %v1202_v49 = vpop.f32.mrf.mxu0 }
 0x4a9   : > { %v1216_v20 = vadd.f32 %v2165_v46, %v1183_v18 }
 0x4ab   : > { %v1297_v40 = vmul.f32 %v1256_v45, %v1216_v20 }
 0x4ad   : > { %v1309_v38 = vpack.c.bf16 %v1297_v40, %v1296_v29 }
 0x4ae   : > { %v1100_v25 = vpop.f32.mrf.mxu3 }
 0x4af   : > { %v1186_v52 = vadd.f32 %v1185_v15, %v1100_v25 }
 0x4b6   : > { %v1102_v32 = vpop.f32.mrf.mxu3 }
 0x4b7   : > { %v1188_v2 = vadd.f32 %v1187_v28, %v1102_v32 }
 0x4b9   : > { %v1218_v9 = vadd.f32 %v2165_v46, %v1188_v2 }
 0x4bb   : > { %v1299_v12 = vmul.f32 %v2167_v47, %v1218_v9 }
 0x4be   : > { %v1105_v36 = vpop.f32.mrf.mxu3 }
 0x4bf   : > { %v1191_v19 = vadd.f32 %v1190_v62, %v1105_v36 }
 0x4c1   : > { %v1219_v7 = vadd.f32 %v2165_v46, %v1191_v19 }
 0x4c6   : > { %v1107_v41 = vpop.f32.mrf.mxu3 }
 0x4c7   : > { %v1193_v60 = vadd.f32 %v1192_v50, %v1107_v41 }
 0x4c9   : > { %v1220_v4 = vadd.f32 %v2165_v46, %v1193_v60 }
 0x4cb   : > { %v1301_v10 = vmul.f32 %v2155_v30, %v1220_v4  ;;  %v1225_v30 = vld [vmem:[%s2258_s2] sm:$0xf] }
 0x4ce   : > { %v1110_v43 = vpop.f32.mrf.mxu3 }
 0x4cf   : > { %v1196_v33 = vadd.f32 %v1195_v42, %v1110_v43 }
 0x4d1   : > { %v1221_v21 = vadd.f32 %v2165_v46, %v1196_v33 }
 0x4d3   : > { %v1302_v8 = vmul.f32 %v2160_v35, %v1221_v21 }
 0x4d6   : > { %v1112_v48 = vpop.f32.mrf.mxu3 }
 0x4d7   : > { %v1198_v44 = vadd.f32 %v1197_v22, %v1112_v48 }
 0x4d9   : > { %v1222_v61 = vadd.f32 %v2165_v46, %v1198_v44 }
 0x4db   : > { %v1303_v5 = vmul.f32 %v2151_v54, %v1222_v61 }
 0x4dd   : > { %v1312_v11 = vpack.c.bf16 %v1303_v5, %v1302_v8 }
 0x4de   : > { %v1115_v23 = vpop.f32.mrf.mxu3 }
 0x4df   : > { %v1201_v17 = vadd.f32 %v1200_v39, %v1115_v23 }
 0x4e1   : > { %v1223_v45 = vadd.f32 %v2165_v46, %v1201_v17 }
 0x4e3   : > { %v1304_v26 = vmul.f32 %v2146_v24, %v1223_v45  ;;  %v1217_v24 = vadd.f32 %v2165_v46, %v1186_v52 }
 0x4e5   : > { %v1298_v54 = vmul.f32 %v2157_v31, %v1217_v24  ;;  %v1588_v31 = vld [vmem:[%s2264_s8] sm:$0xff] }
 0x4e6   : > { %v1117_v56 = vpop.f32.mrf.mxu3 }
 0x4e7   : > { %v1203_v58 = vadd.f32 %v1202_v49, %v1117_v56  ;;  %v1310_v15 = vpack.c.bf16 %v1299_v12, %v1298_v54 }
 0x4e9   : > { %v1224_v37 = vadd.f32 %v2165_v46, %v1203_v58 }
 0x4eb   : > { %v1305_v57 = vmul.f32 %v2148_v27, %v1224_v37  ;;  %v1300_v27 = vmul.f32 %v2153_v59, %v1219_v7  ;;  %v1589_v59 = vld [vmem:[%s2264_s8 + $0x8] sm:$0xff] }
 0x4ed   : > { %v1313_v6 = vpack.c.bf16 %v1305_v57, %v1304_v26  ;;  %v1311_v14 = vpack.c.bf16 %v1301_v10, %v1300_v27 }
 0x4ef   : > { %1314 = vmatpush.bf16.msra.mxu1 %v1313_v6 }
 0x4f3   : > { %1315 = vmatpush.bf16.msra.mxu1 %v1312_v11 }
 0x4f7   : > { %1316 = vmatpush.bf16.msra.mxu1 %v1311_v14 }
 0x4fb   : > { %1317 = vmatpush.bf16.msra.mxu1 %v1310_v15 }
 0x4ff   : > { %1318 = vmatpush.bf16.msra.mxu1 %v1309_v38 }
 0x503   : > { %1319 = vmatpush.bf16.msra.mxu1 %v1308_v13 }
 0x507   : > { %1320 = vmatpush.bf16.msra.mxu1 %v1307_v3 }
 0x50b   : > { %1321 = vmatpush.bf16.msra.mxu1 %v1306_v53 }
 0x50e   : > { %1322 = vmatmul.bf16.vlgmr.msra.gmra.mxu1 %v1225_v30 }
 0x50f   : > { %1357 = vmatpush.bf16.msrb.mxu1 %v1589_v59 }
 0x513   : > { %1358 = vmatpush.bf16.msrb.mxu1 %v1588_v31 }
 0x58b   : > { %v1323_v35 = vpop.f32.mrf.mxu1 }
 0x58c   : > { %v1327_v46 = vpack.c.bf16 %v1323_v35, %v1323_v35 }
 0x58e   : > { %1565 = vmatmul.msk.bf16.vlgmr.msrb.gmra.mxu1 %vm767_vm0, %v1327_v46 }
 0x593   : > { %v1325_v47 = vpop.f32.mrf.mxu1 }
 0x60b   : > { %v1360_v55 = vpop.f32.mrf.mxu1 }
 0x60c   : > { %v1361_v53 = vadd.f32 %v1650_v51, %v1360_v55 }
 0x60e   : > { %1364 = vst [vmem:[%s367_s30] sm:$0xff] %v1361_v53 }
 0x60f   : > { %1678 = shalt.err (!%p1675_p3)
}
 0x610   : > { %1598 = dma.vmem_to_hbm [thread:$0]  (%p1810_p5), %s1379_s11, 128, %s1381_s12, %s1366_s0  }
 0x613   : > { %v1362_v34 = vpop.f32.mrf.mxu1 }
 0x614 PF: > { %p1604_p4 = scmp.ge.s32.totalorder %s1713_s16, 2  ;;  %s1392_s18 = sand.u32 1, %s1701_s13  }
 0x615   : > { %s1393_s25 = scalar_lea.sflag [#allocation3], %s1392_s18 }
 0x616   : > { %p1601_p7 = pnand %p1604_p4, %p1814_p6 }
 0x618   : > { %p1602_p8 = pneg %p1601_p7 }
 0x61a   : > { %1696 = dma.done.wait (%p1602_p8), %s1393_s25, 128  }
 0x61b   : > { %1698 = vsyncadd (%p1602_p8), %s1393_s25, 4294967168  ;;  %p20_p9 = scmp.ge.s32.totalorder %s1797_s19, 4   ;;  %s2273_s13 = smov %s1705_s14 }
 0x61c   : > { %s2274_s14 = smov %s1709_s15  ;;  %s2275_s15 = smov %s1808_s22 }
 0x61d   : > { %s2276_s16 = smov %s1797_s19  ;;  %22 = sbr.rel (!%p20_p9) target bundleno = 6 (0x6), region = 98 }
 0x622   :  { %1399 = vsyncpa [#allocation3], 1 }
 0x623   :  { %1401 = vsyncpa [#allocation3 + $0x1], 1 }

</bundles_post_ra>
